<compile_context>
chip_gen: v6e
topology: v6e:2x2x1
jax: 0.10.0
libtpu: 0.0.40
codegen_flags: <defaults>
</compile_context>

<pallas_src>
import functools

import jax
import jax.numpy as jnp
from jax.experimental import pallas as pl
from jax.experimental.pallas import tpu as pltpu


# ---------------------------------------------------------------------------
# Kernel
# ---------------------------------------------------------------------------
def _mbc_kernel(x_ref, w_ref, b_ref, *rest, hw_total, compute_loss):
    # Grid = (batch_tiles [parallel], hw_tiles [arbitrary/reduction]).
    #   x_ref:    (B_t, C, HW_t)   activations tile (any float dtype)
    #   w_ref:    (C, NCP)         fc weight, classes padded to lane width
    #   b_ref:    (1, NCP)         fc bias (padded)
    #   t_ref:    (B_t, NCP)       targets (padded)          [loss only]
    #   mask_ref: (1, NCP)         1.0 for real classes      [loss only]
    #   probs_ref:(B_t, NCP)       sigmoid outputs (padded)
    #   bce_ref:  (B_t, NCP)       per-element masked BCE    [loss only]
    #   feat_acc: (B_t, C) f32     running spatial sum (VMEM scratch)
    if compute_loss:
        t_ref, mask_ref, probs_ref, bce_ref, feat_acc = rest
    else:
        probs_ref, feat_acc = rest

    hw_i = pl.program_id(1)

    @pl.when(hw_i == 0)
    def _init():
        feat_acc[...] = jnp.zeros_like(feat_acc)

    # Partial global-average-pool: reduce this spatial chunk over the lane
    # (hw) axis.  Zero-padded hw positions contribute nothing.  Accumulation
    # is always f32 (bf16 inputs are upcast on load).
    feat_acc[...] += jnp.sum(x_ref[...].astype(jnp.float32), axis=-1)

    @pl.when(hw_i == pl.num_programs(1) - 1)
    def _finalize():
        feat = feat_acc[...] * (1.0 / float(hw_total))          # (B_t, C)
        logits = jnp.dot(feat, w_ref[...],
                         preferred_element_type=jnp.float32) + b_ref[...]
        probs = jax.nn.sigmoid(logits)                          # (B_t, NCP)
        probs_ref[...] = probs
        if compute_loss:
            t = t_ref[...]
            # PyTorch BCELoss clamps the log terms at -100 (not BCEWithLogits).
            log_p = jnp.maximum(jnp.log(probs), -100.0)
            log_1mp = jnp.maximum(jnp.log(1.0 - probs), -100.0)
            bce_ref[...] = -(t * log_p + (1.0 - t) * log_1mp) * mask_ref[...]


# ---------------------------------------------------------------------------
# Static, shape-driven tiling helpers
# ---------------------------------------------------------------------------
def _vmem_capacity_bytes():
    try:
        return int(pltpu.get_tpu_info().vmem_capacity_bytes)
    except Exception:                       # pragma: no cover
        return 64 << 20                     # v7x per-TC (smallest current part)


def _pick_batch_tile(B):
    # Prefer >= 2 batch tiles so the "parallel" axis shards across the two
    # TensorCores on v7x, while keeping 2-D output blocks sublane-aligned
    # (multiple of 8).  Small / odd batches fall back to a single tile.
    for cand in (256, 128, 64, 32, 16, 8):
        if B % cand == 0 and B // cand >= 2:
            return cand
    return B


def _choose_hw_tiling(HW, b_tile, C, itemsize, budget_bytes):
    """Return (HW_pad, hw_t): hw_t is a multiple of 128 unless it spans HW."""
    if b_tile * C * HW * itemsize <= budget_bytes:
        return HW, HW                       # single hw step; no 128 constraint
    HW_pad = ((HW + 127) // 128) * 128
    max_lanes = max(128, (budget_bytes // (itemsize * b_tile * C)) // 128 * 128)
    hw_t = 128
    for cand in range(128, min(HW_pad, max_lanes) + 1, 128):
        if HW_pad % cand == 0:
            hw_t = cand
    return HW_pad, hw_t


# ---------------------------------------------------------------------------
# Forward wrapper (mirrors MultiBinaryClassificationModel.forward)
# ---------------------------------------------------------------------------
@functools.partial(jax.jit, static_argnames=("hw_tile",))
def multi_binary_classification_forward(x_nchw, fc_w, fc_b, targets=None,
                                        *, hw_tile=None):
    """Returns (losses_dict, probs) just like the PyTorch module.

    Args:
      x_nchw:  (B, C, H, W) activations (f32 or bf16).
      fc_w:    (C, num_classes) fc weight.
      fc_b:    (num_classes,) fc bias.
      targets: (B, num_classes) stacked binary targets, or None (no loss).
      hw_tile: optional spatial chunk size (== H*W or a multiple of 128).
    """
    B, C, H, W = x_nchw.shape
    HW = H * W
    NC = fc_w.shape[1]
    NCP = ((NC + 127) // 128) * 128                 # lane-dense class padding
    compute_loss = targets is not None

    # (B, C, H, W) -> (B, C, HW): pure reshape of contiguous dims, no data
    # movement.  C rides sublanes, the spatial axis rides lanes.
    x_flat = x_nchw.reshape(B, C, HW)
    itemsize = x_flat.dtype.itemsize

    vmem_cap = _vmem_capacity_bytes()
    budget = int(min(24 << 20, max(8 << 20, vmem_cap // 5)))  # per x buffer

    b_tile = _pick_batch_tile(B)
    if hw_tile is None:
        HW_pad, hw_t = _choose_hw_tiling(HW, b_tile, C, itemsize, budget)
    else:
        assert hw_tile == HW or hw_tile % 128 == 0
        hw_t = hw_tile
        HW_pad = ((HW + hw_t - 1) // hw_t) * hw_t
    if HW_pad != HW:
        # Zero padding is exact: pads add 0 to the sum; we divide by true HW.
        x_flat = jnp.pad(x_flat, ((0, 0), (0, 0), (0, HW_pad - HW)))
    grid = (B // b_tile, HW_pad // hw_t)

    # Padded, lane-dense parameters / targets.
    w_pad = jnp.zeros((C, NCP), jnp.float32).at[:, :NC].set(
        fc_w.astype(jnp.float32))
    b_pad = jnp.zeros((1, NCP), jnp.float32).at[0, :NC].set(
        fc_b.astype(jnp.float32))

    in_specs = [
        pl.BlockSpec((b_tile, C, hw_t), lambda b, h: (b, 0, h)),
        pl.BlockSpec((C, NCP), lambda b, h: (0, 0)),
        pl.BlockSpec((1, NCP), lambda b, h: (0, 0)),
    ]
    args = [x_flat, w_pad, b_pad]
    out_shapes = [jax.ShapeDtypeStruct((B, NCP), jnp.float32)]
    out_specs = [pl.BlockSpec((b_tile, NCP), lambda b, h: (b, 0))]

    if compute_loss:
        t_pad = jnp.zeros((B, NCP), jnp.float32).at[:, :NC].set(
            targets.astype(jnp.float32))
        cls_mask = jnp.zeros((1, NCP), jnp.float32).at[0, :NC].set(1.0)
        in_specs += [
            pl.BlockSpec((b_tile, NCP), lambda b, h: (b, 0)),   # targets
            pl.BlockSpec((1, NCP), lambda b, h: (0, 0)),        # class mask
        ]
        args += [t_pad, cls_mask]
        out_shapes.append(jax.ShapeDtypeStruct((B, NCP), jnp.float32))
        out_specs.append(pl.BlockSpec((b_tile, NCP), lambda b, h: (b, 0)))

    # VMEM: double-buffered x tile + params/outputs/scratch + headroom,
    # clamped to the physical per-core capacity minus slack.
    x_tile_bytes = b_tile * C * hw_t * itemsize
    small_bytes = ((C * NCP + 2 * NCP) * 4 + b_tile * C * 4
                   + b_tile * NCP * 4 * (3 if compute_loss else 1))
    vmem_limit = int(min(max(vmem_cap - (8 << 20), 16 << 20),
                         max(16 << 20,
                             2 * x_tile_bytes + 2 * small_bytes + (4 << 20))))

    flops = B * HW * C + 2 * B * C * NCP + 8 * B * NCP
    transcendentals = 3 * B * NCP
    bytes_accessed = (B * HW_pad * C * itemsize + (C * NCP + 2 * NCP) * 4
                      + B * NCP * 4 * (3 if compute_loss else 1))

    kernel = functools.partial(_mbc_kernel, hw_total=HW,
                               compute_loss=compute_loss)

    results = pl.pallas_call(
        kernel,
        out_shape=tuple(out_shapes),
        grid_spec=pltpu.PrefetchScalarGridSpec(
            num_scalar_prefetch=0,
            grid=grid,
            in_specs=in_specs,
            out_specs=tuple(out_specs),
            scratch_shapes=[pltpu.VMEM((b_tile, C), jnp.float32)],
        ),
        compiler_params=pltpu.CompilerParams(
            dimension_semantics=("parallel", "arbitrary"),
            vmem_limit_bytes=vmem_limit,
        ),
        cost_estimate=pl.CostEstimate(
            flops=flops,
            transcendentals=transcendentals,
            bytes_accessed=bytes_accessed,
        ),
    )(*args)

    if compute_loss:
        probs_pad, bce_pad = results
        # Tiny finalization (sum of a (B, 128) slab) — safe w.r.t. the
        # parallel batch axis; matches BCELoss reduction='mean' over B*NC.
        loss = jnp.sum(bce_pad) / (B * NC)
        losses = {"classification_loss": loss}
    else:
        (probs_pad,) = results
        losses = {}

    probs = probs_pad[:, :NC]
    return losses, probs


# ---------------------------------------------------------------------------
# Pure-JAX reference (PyTorch semantics)
# ---------------------------------------------------------------------------
def _reference(x_nchw, fc_w, fc_b, targets):
    B, C = x_nchw.shape[:2]
    feat = jnp.mean(x_nchw.reshape(B, C, -1).astype(jnp.float32), axis=-1)
    probs = jax.nn.sigmoid(feat @ fc_w.astype(jnp.float32) + fc_b[None, :])
    if targets is None:
        return None, probs
    log_p = jnp.maximum(jnp.log(probs), -100.0)
    log_1mp = jnp.maximum(jnp.log(1.0 - probs), -100.0)
    loss = -jnp.mean(targets * log_p + (1.0 - targets) * log_1mp)
    return loss, probs


if __name__ == "__main__":
    B, C, H, W = 2, 4, 16, 16
    NUM_CLASSES = 8

    key = jax.random.PRNGKey(0)
    kx, kw, kb, kt = jax.random.split(key, 4)

    x = jax.random.normal(kx, (B, C, H, W), dtype=jnp.float32)
    fc_w = (jax.random.normal(kw, (C, NUM_CLASSES), dtype=jnp.float32)
            * (1.0 / jnp.sqrt(C)))
    fc_b = jax.random.normal(kb, (NUM_CLASSES,), dtype=jnp.float32) * 0.01
    targets = jax.random.bernoulli(kt, 0.5, (B, NUM_CLASSES)).astype(jnp.float32)

    # hw_tile=128 -> 2 spatial grid steps: exercises the cross-step accumulator.
    losses, outputs = multi_binary_classification_forward(
        x, fc_w, fc_b, targets, hw_tile=128)
    jax.block_until_ready((losses, outputs))

    ref_loss, ref_probs = _reference(x, fc_w, fc_b, targets)
    assert jnp.allclose(outputs, ref_probs, atol=1e-5, rtol=1e-5)
    assert jnp.allclose(losses["classification_loss"], ref_loss,
                        atol=1e-5, rtol=1e-5)

    # Auto-tiled path (single hw step for this small shape).
    losses_auto, outputs_auto = multi_binary_classification_forward(
        x, fc_w, fc_b, targets)
    jax.block_until_ready((losses_auto, outputs_auto))
    assert jnp.allclose(outputs_auto, ref_probs, atol=1e-5, rtol=1e-5)
    assert jnp.allclose(losses_auto["classification_loss"], ref_loss,
                        atol=1e-5, rtol=1e-5)

    # targets=None path: PyTorch returns an empty losses dict.
    losses_none, outputs_none = multi_binary_classification_forward(
        x, fc_w, fc_b, None, hw_tile=128)
    jax.block_until_ready(outputs_none)
    assert losses_none == {}
    assert jnp.allclose(outputs_none, ref_probs, atol=1e-5, rtol=1e-5)

    print("KERNEL_OK")
</pallas_src>

<mosaic_0001>
module attributes {stable_mosaic.version = 11 : i64} {
  func.func @_mbc_kernel(%arg0: i32, %arg1: i32, %arg2: memref<2x4x128xf32, #tpu.memory_space<vmem>>, %arg3: memref<4x128xf32, #tpu.memory_space<vmem>>, %arg4: memref<1x128xf32, #tpu.memory_space<vmem>>, %arg5: memref<2x128xf32, #tpu.memory_space<vmem>>, %arg6: memref<1x128xf32, #tpu.memory_space<vmem>>, %arg7: memref<2x128xf32, #tpu.memory_space<vmem>>, %arg8: memref<2x128xf32, #tpu.memory_space<vmem>>, %arg9: memref<2x4xf32, #tpu.memory_space<vmem>>) attributes {dimension_semantics = [#tpu.dimension_semantics<parallel>, #tpu.dimension_semantics<arbitrary>], iteration_bounds = array<i64: 1, 2>, scalar_prefetch = 0 : i64, scratch_operands = 1 : i64, tpu.core_type = #tpu.core_type<tc>, window_params = [{transform_indices = @transform_0, window_bounds = array<i64: 2, 4, 128>}, {pipeline_mode = #tpu.pipeline_mode<synchronous>, transform_indices = @transform_1, window_bounds = array<i64: 4, 128>}, {pipeline_mode = #tpu.pipeline_mode<synchronous>, transform_indices = @transform_2, window_bounds = array<i64: 1, 128>}, {transform_indices = @transform_3, window_bounds = array<i64: 2, 128>}, {pipeline_mode = #tpu.pipeline_mode<synchronous>, transform_indices = @transform_4, window_bounds = array<i64: 1, 128>}, {transform_indices = @transform_5, window_bounds = array<i64: 2, 128>}, {transform_indices = @transform_6, window_bounds = array<i64: 2, 128>}]} {
    %c0_i32 = arith.constant 0 : i32
    %0 = arith.cmpi eq, %arg1, %c0_i32 : i32
    %1 = arith.extui %0 : i1 to i32
    %c0_i32_0 = arith.constant 0 : i32
    %2 = arith.cmpi ne, %1, %c0_i32_0 : i32
    scf.if %2 {
      %cst_8 = arith.constant 0.000000e+00 : f32
      %11 = vector.broadcast %cst_8 : f32 to vector<2x4xf32>
      %c0_9 = arith.constant 0 : index
      %c0_10 = arith.constant 0 : index
      %12 = vector.load %arg9[%c0_9, %c0_10] : memref<2x4xf32, #tpu.memory_space<vmem>>, vector<2x4xf32>
      tpu.vector_store %arg9[%c0_9, %c0_10], %11 {strides = array<i32>} : memref<2x4xf32, #tpu.memory_space<vmem>>, vector<2x4xf32>,
    } else {
    }
    %c0 = arith.constant 0 : index
    %c0_1 = arith.constant 0 : index
    %3 = vector.load %arg9[%c0, %c0_1] : memref<2x4xf32, #tpu.memory_space<vmem>>, vector<2x4xf32>
    %c0_2 = arith.constant 0 : index
    %c0_3 = arith.constant 0 : index
    %c0_4 = arith.constant 0 : index
    %4 = vector.load %arg2[%c0_2, %c0_3, %c0_4] : memref<2x4x128xf32, #tpu.memory_space<vmem>>, vector<2x4x128xf32>
    %cst = arith.constant dense<0.000000e+00> : vector<2x4xf32>
    %5 = vector.multi_reduction <add>, %4, %cst [2] : vector<2x4x128xf32> to vector<2x4xf32>
    %6 = arith.addf %3, %5 : vector<2x4xf32>
    %c0_5 = arith.constant 0 : index
    %c0_6 = arith.constant 0 : index
    %7 = vector.load %arg9[%c0_5, %c0_6] : memref<2x4xf32, #tpu.memory_space<vmem>>, vector<2x4xf32>
    tpu.vector_store %arg9[%c0_5, %c0_6], %6 {strides = array<i32>} : memref<2x4xf32, #tpu.memory_space<vmem>>, vector<2x4xf32>,
    %c1_i32 = arith.constant 1 : i32
    %8 = arith.cmpi eq, %arg1, %c1_i32 : i32
    %9 = arith.extui %8 : i1 to i32
    %c0_i32_7 = arith.constant 0 : i32
    %10 = arith.cmpi ne, %9, %c0_i32_7 : i32
    scf.if %10 {
      %c0_8 = arith.constant 0 : index
      %c0_9 = arith.constant 0 : index
      %11 = vector.load %arg9[%c0_8, %c0_9] : memref<2x4xf32, #tpu.memory_space<vmem>>, vector<2x4xf32>
      %cst_10 = arith.constant 3.906250e-03 : f32
      %12 = vector.broadcast %cst_10 : f32 to vector<2x4xf32>
      %13 = arith.mulf %11, %12 : vector<2x4xf32>
      %c0_11 = arith.constant 0 : index
      %c0_12 = arith.constant 0 : index
      %14 = vector.load %arg3[%c0_11, %c0_12] : memref<4x128xf32, #tpu.memory_space<vmem>>, vector<4x128xf32>
      %cst_13 = arith.constant dense<0.000000e+00> : vector<2x128xf32>
      %15 = tpu.matmul %13, %14, %cst_13 {dimension_numbers = #tpu.dot_dimension_numbers<[1], [0], [0], [1], [0, 0, 1, 1], [], []>} : vector<2x4xf32>, vector<4x128xf32>, vector<2x128xf32> -> vector<2x128xf32>
      %c0_14 = arith.constant 0 : index
      %c0_15 = arith.constant 0 : index
      %16 = vector.load %arg4[%c0_14, %c0_15] : memref<1x128xf32, #tpu.memory_space<vmem>>, vector<1x128xf32>
      %17 = vector.broadcast %16 : vector<1x128xf32> to vector<2x128xf32>
      %18 = arith.addf %15, %17 : vector<2x128xf32>
      %19 = arith.negf %18 : vector<2x128xf32>
      %20 = math.exp %19 : vector<2x128xf32>
      %cst_16 = arith.constant 1.000000e+00 : f32
      %21 = vector.broadcast %cst_16 : f32 to vector<2x128xf32>
      %22 = arith.addf %21, %20 : vector<2x128xf32>
      %23 = arith.divf %21, %22 : vector<2x128xf32>
      %c0_17 = arith.constant 0 : index
      %c0_18 = arith.constant 0 : index
      %24 = vector.load %arg7[%c0_17, %c0_18] : memref<2x128xf32, #tpu.memory_space<vmem>>, vector<2x128xf32>
      tpu.vector_store %arg7[%c0_17, %c0_18], %23 {strides = array<i32>} : memref<2x128xf32, #tpu.memory_space<vmem>>, vector<2x128xf32>,
      %c0_19 = arith.constant 0 : index
      %c0_20 = arith.constant 0 : index
      %25 = vector.load %arg5[%c0_19, %c0_20] : memref<2x128xf32, #tpu.memory_space<vmem>>, vector<2x128xf32>
      %26 = math.log %23 : vector<2x128xf32>
      %cst_21 = arith.constant -1.000000e+02 : f32
      %27 = vector.broadcast %cst_21 : f32 to vector<2x128xf32>
      %28 = arith.maximumf %26, %27 : vector<2x128xf32>
      %cst_22 = arith.constant 1.000000e+00 : f32
      %29 = vector.broadcast %cst_22 : f32 to vector<2x128xf32>
      %30 = arith.subf %29, %23 : vector<2x128xf32>
      %31 = math.log %30 : vector<2x128xf32>
      %cst_23 = arith.constant -1.000000e+02 : f32
      %32 = vector.broadcast %cst_23 : f32 to vector<2x128xf32>
      %33 = arith.maximumf %31, %32 : vector<2x128xf32>
      %34 = arith.mulf %25, %28 : vector<2x128xf32>
      %cst_24 = arith.constant 1.000000e+00 : f32
      %35 = vector.broadcast %cst_24 : f32 to vector<2x128xf32>
      %36 = arith.subf %35, %25 : vector<2x128xf32>
      %37 = arith.mulf %36, %33 : vector<2x128xf32>
      %38 = arith.addf %34, %37 : vector<2x128xf32>
      %cst_25 = arith.constant 0.000000e+00 : f32
      %39 = vector.broadcast %cst_25 : f32 to vector<2x128xf32>
      %40 = arith.subf %39, %38 : vector<2x128xf32>
      %c0_26 = arith.constant 0 : index
      %c0_27 = arith.constant 0 : index
      %41 = vector.load %arg6[%c0_26, %c0_27] : memref<1x128xf32, #tpu.memory_space<vmem>>, vector<1x128xf32>
      %42 = vector.broadcast %41 : vector<1x128xf32> to vector<2x128xf32>
      %43 = arith.mulf %40, %42 : vector<2x128xf32>
      %c0_28 = arith.constant 0 : index
      %c0_29 = arith.constant 0 : index
      %44 = vector.load %arg8[%c0_28, %c0_29] : memref<2x128xf32, #tpu.memory_space<vmem>>, vector<2x128xf32>
      tpu.vector_store %arg8[%c0_28, %c0_29], %43 {strides = array<i32>} : memref<2x128xf32, #tpu.memory_space<vmem>>, vector<2x128xf32>,
    } else {
    }
    return
  }
  func.func @transform_0(%arg0: i32, %arg1: i32) -> (i32, i32, i32) {
    %c0_i32 = arith.constant 0 : i32
    %c0_i32_0 = arith.constant 0 : i32
    return %arg0, %c0_i32, %arg1 : i32, i32, i32
  }
  func.func @transform_1(%arg0: i32, %arg1: i32) -> (i32, i32) {
    %c0_i32 = arith.constant 0 : i32
    %c0_i32_0 = arith.constant 0 : i32
    %c0_i32_1 = arith.constant 0 : i32
    return %c0_i32, %c0_i32_0 : i32, i32
  }
  func.func @transform_2(%arg0: i32, %arg1: i32) -> (i32, i32) {
    %c0_i32 = arith.constant 0 : i32
    %c0_i32_0 = arith.constant 0 : i32
    %c0_i32_1 = arith.constant 0 : i32
    return %c0_i32, %c0_i32_0 : i32, i32
  }
  func.func @transform_3(%arg0: i32, %arg1: i32) -> (i32, i32) {
    %c0_i32 = arith.constant 0 : i32
    %c0_i32_0 = arith.constant 0 : i32
    return %arg0, %c0_i32 : i32, i32
  }
  func.func @transform_4(%arg0: i32, %arg1: i32) -> (i32, i32) {
    %c0_i32 = arith.constant 0 : i32
    %c0_i32_0 = arith.constant 0 : i32
    %c0_i32_1 = arith.constant 0 : i32
    return %c0_i32, %c0_i32_0 : i32, i32
  }
  func.func @transform_5(%arg0: i32, %arg1: i32) -> (i32, i32) {
    %c0_i32 = arith.constant 0 : i32
    %c0_i32_0 = arith.constant 0 : i32
    return %arg0, %c0_i32 : i32, i32
  }
  func.func @transform_6(%arg0: i32, %arg1: i32) -> (i32, i32) {
    %c0_i32 = arith.constant 0 : i32
    %c0_i32_0 = arith.constant 0 : i32
    return %arg0, %c0_i32 : i32, i32
  }
}

</mosaic_0001>

<bundles_post_ra>
// kernel: multi_binary_classification_forward.1
= control target key start
LH: loop header
LB: loop body
LE: loop exit
PB: predicated region body
PF: predicated region fallthrough
CT: control target
= control target key end

     0   :  { %12 = vsyncpa [#allocation5], 0  ;;  %s792_s21 = smov 0   ;;  %s794_s22 = smov 0   ;;  %s891_s0 = inlined_call_operand.vmem [shape: f32[2,4,256], index: 0, kind: input, shape index: {}]   ;;  %s892_s1 = inlined_call_operand.vmem [shape: f32[4,128], index: 1, kind: input, shape index: {}]   ;;  %s893_s2 = inlined_call_operand.vmem [shape: f32[1,128], index: 2, kind: input, shape index: {}]   ;;  %s894_s3 = inlined_call_operand.vmem [shape: f32[2,128], index: 3, kind: input, shape index: {}]   ;;  %s895_s4 = inlined_call_operand.vmem [shape: f32[1,128], index: 4, kind: input, shape index: {}]   ;;  %s896_s5 = inlined_call_operand.hbm [shape: f32[2,128], index: 5, kind: output, shape index: {0}]   ;;  %s897_s6 = inlined_call_operand.vmem [shape: f32[2,128], index: 6, kind: output, shape index: {1}]  }
   0x1   :  { %s796_s23 = smov 0   ;;  %s798_s24 = smov 0  }
   0x2   :  { %s800_s25 = smov 0  }
   0x3 LB: > { %s600_s26 = sadd.s32 4294967295, %s751_s25   ;;  %s27_s27 = sadd.s32 1, %s747_s24  ;;  %s751_s25 = sphi %s800_s25, %s18_s25   ;;  %s747_s24 = sphi %s798_s24, %s902_s24   ;;  %s743_s23 = sphi %s796_s23, %s901_s23   ;;  %s739_s22 = sphi %s794_s22, %s900_s22   ;;  %s735_s21 = sphi %s792_s21, %s899_s21  }
   0x4   : > { %p28_p0 = scmp.ge.s32.totalorder %s27_s27, 2  ;;  %p46_p1 = scmp.ne.s32.totalorder %s739_s22, %s735_s21 }
   0x5   : > { %p47_p2 = scmp.eq.s32.totalorder %s751_s25, 0  ;;  %s39_s29 = sadd.s32 1, %s739_s22 }
   0x6   : > { %s904_s27 = smov (%p28_p0, %s27_s27), 0  ;;  %p603_p5 = scmp.ge.s32.totalorder %s751_s25, 2 }
   0x7   : > { %p48_p3 = por %p47_p2, %p46_p1  ;;  %s35_s28 = ssub.s32 %s747_s24, %s904_s27 }
   0x8   : > { %p37_p4 = scmp.eq.s32.totalorder %s35_s28, 0  ;;  %229 = sbr.rel (%p603_p5) target bundleno = 18 (0x12), region = 32 }
   0xa   : > { %s828_s30 = scalar_select %p37_p4, %s739_s22, %s39_s29  }
   0xd   : > { %232 = sbr.rel (!%p48_p3) target bundleno = 18 (0x12), region = 36  ;;  %s234_s7 = sand.u32 (%p48_p3), 1, %s739_s22  }
   0xe   : > { %s605_s8 = sshll.u32 (%p48_p3), %s747_s24, 2  ;;  %s604_s9 = sshll.u32 (%p48_p3), %s234_s7, 3 }
   0xf   : > { %s241_s12 = scalar_lea.vmem (%p48_p3), %s891_s0, %s605_s8  ;;  %s236_s13 = scalar_lea.vmem (%p48_p3), [#allocation3], %s604_s9 }
  0x10   : > { %v258_v0 = vld [vmem:[%s241_s12] sm:$0xf] (%p48_p3)  ;;  %v260_v1 = vld [vmem:[%s241_s12 + $0x8] sm:$0xf] (%p48_p3) }
  0x11   : > { %259 = vst [vmem:[%s236_s13] sm:$0xf] (%p48_p3), %v258_v0  ;;  %261 = vst [vmem:[%s236_s13 + $0x4] sm:$0xf] (%p48_p3), %v260_v1 }
  0x12 PF: > { %p606_p6 = scmp.ge.s32.totalorder %s751_s25, 1  ;;  %p288_p7 = scmp.lt.s32.totalorder %s751_s25, 3 }
  0x14   : > { %p289_p8 = pnand %p606_p6, %p288_p7 }
  0x15   : > { %s295_s14 = sand.u32 (!%p289_p8), 1, %s735_s21   ;;  %p608_p9 = scmp.ne.s32.totalorder (!%p289_p8), %s743_s23, 0 }
  0x16   : > { %292 = sbr.rel (%p289_p8) target bundleno = 464 (0x1d0), region = 77  ;;  %s607_s15 = sshll.u32 (!%p289_p8), %s295_s14, 3 }
  0x17   : > { %s297_s16 = scalar_lea.vmem (!%p289_p8), [#allocation3], %s607_s15 }
  0x1b   : > { %339 = sbr.rel (%p608_p9) target bundleno = 34 (0x22), region = 85 }
  0x20   : > { %vm340_vm0 = vcmask 25600   ;;  %v753_v2 = vmov 0.0  }
  0x21   : > { %341 = vst.msk [vmem:[#allocation2] sm:$0x3] %vm340_vm0, %v753_v2 }
  0x22 PF: > { %v343_v3 = vld [vmem:[%s297_s16] sm:$0xf]  ;;  %vm345_vm1 = vcmask 1043456   ;;  %v344_v4 = vld [vmem:[%s297_s16 + $0x4] sm:$0xf]  ;;  %v354_v7 = vlaneseq  ;;  %vm364_vm2 = vcmask 1041409  }
  0x23   : > { %v346_v5 = vsel %vm345_vm1, %v343_v3, 0.0  ;;  %v349_v6 = vsel %vm345_vm1, %v344_v4, 0.0  ;;  %vm368_vm3 = vcmask 25600   ;;  %p609_p10 = scmp.ne.s32.totalorder %s743_s23, 1 }
  0x24   : > { %347 = vadd.xlane.f32.xlu0 %v346_v5  ;;  %v355_v8 = vand.u32 127, %v354_v7  ;;  %v357_v9 = vshrl.u32 %v354_v7, 7 }
  0x26   : > { %v358_v11 = vsub.s32 %v355_v8, %v357_v9 }
  0x28   : > { %350 = vadd.xlane.f32.xlu0 %v349_v6  ;;  %v342_v14 = vld [vmem:[#allocation2] sm:$0x3] }
  0xad   : > { %v348_v10 = vpop.xlane.xlu0 %347 }
  0xae   : > { %v359_v13 = vrot.slane %v348_v10, %v358_v11 }
  0xb1   : > { %v351_v12 = vpop.xlane.xlu0 %350 }
  0xb2   : > { %v363_v15 = vrot.slane %v351_v12, %v358_v11 }
  0xb3   : > { %373 = sbr.rel (%p609_p10) target bundleno = 449 (0x1c1), region = 89 }
  0xb4   : > { %v365_v16 = vsel %vm364_vm2, %v363_v15, %v359_v13 }
  0xb5   : > { %v367_v17 = vadd.f32 %v365_v16, %v342_v14 }
  0xb7   : > { %369 = vst.msk [vmem:[#allocation2] sm:$0x3] %vm368_vm3, %v367_v17 }
  0xb8   : > { %v376_v18 = vld [vmem:[%s892_s1] sm:$0xf]  ;;  %v754_v20 = vmov 0.0   ;;  %vm755_vm4 = vmmov 0   ;;  %vm384_vm5 = vcmask 31744  }
  0xb9   : > { %622 = vmatprep.subr.mxu0 %v754_v20  ;;  %624 = vmatprep.mubr.msk.f32.mxu0 %vm755_vm4, %v754_v20  ;;  %v610_v22 = vld [vmem:[%s893_s2] ss:$0 sm:$0xff] }
  0xba   : > { %623 = vmatpush3.msk.msra.mxu0 %vm345_vm1, %v376_v18  ;;  %v468_v32 = vld [vmem:[%s894_s3] sm:$0x3] }
  0xbb   : > { %v477_v37 = vsub.f32 1.0, %v468_v32  ;;  %v614_v42 = vld [vmem:[%s895_s4] ss:$0 sm:$0xff] }
  0xbe   : > { %v374_v19 = vld [vmem:[#allocation2] sm:$0x3] }
  0xbf   : > { %v375_v21 = vmul.f32 0.00390625, %v374_v19 }
  0xc1   : > { %625 = vmatmul.mubr.msk.f32.vlgmr.msra.gmra.mxu0 %vm384_vm5, %v375_v21 }
 0x181   : > { %v457_v23 = vpop.f32.mrf.mxu0 }
 0x182   : > { %v458_v24 = vadd.f32 %v610_v22, %v457_v23 }
 0x183   : > { %v626_v25 = vpop.f32.mrf.mxu0 }
 0x184   : > { %v613_v26 = vmul.f32 -1.442695, %v458_v24 }
 0x186   : > { %677 = vpow2.f32 %v613_v26 }
 0x193   : > { %v678_v27 = vpop.eup %677 }
 0x194   : > { %v464_v28 = vadd.f32 1.0, %v678_v27 }
 0x196   : > { %679 = vrcp.f32 %v464_v28 }
 0x1a3   : > { %v680_v29 = vpop.eup %679 }
 0x1a4   : > { %467 = vst [vmem:[#allocation4] sm:$0x3] %v680_v29  ;;  %681 = vlog2.f32 %v680_v29  ;;  %v472_v30 = vsub.f32 1.0, %v680_v29 }
 0x1a6   : > { %683 = vlog2.f32 %v472_v30 }
 0x1b1   : > { %v682_v31 = vpop.eup %681 }
 0x1b2   : > { %v470_v33 = vmul.f32 0.6931472, %v682_v31 }
 0x1b3   : > { %v684_v34 = vpop.eup %683 }
 0x1b4   : > { %v471_v35 = vmax.f32 %v470_v33, -100.0  ;;  %v474_v36 = vmul.f32 0.6931472, %v684_v34 }
 0x1b6   : > { %v475_v38 = vmax.f32 %v474_v36, -100.0  ;;  %v476_v39 = vmul.f32 %v471_v35, %v468_v32 }
 0x1b8   : > { %v478_v40 = vmul.f32 %v477_v37, %v475_v38 }
 0x1ba   : > { %v479_v41 = vadd.f32 %v478_v40, %v476_v39 }
 0x1bc   : > { %v480_v43 = vsub.f32 0.0, %v479_v41 }
 0x1be   : > { %v488_v44 = vmul.f32 %v614_v42, %v480_v43 }
 0x1c0   : > { %489 = vst [vmem:[%s897_s6] sm:$0x3] %v488_v44 }
 0x1c1 PF: > { %p861_p11 = scmp.eq.s32.totalorder %s600_s26, 1  ;;  %s756_s10 = smov [#allocation4]  }
 0x1c2   : > { %s503_s11 = sshll.u32 %s756_s10, 4  ;;  %s504_s11 = int_to_ptr.vmem [resolvable:$true] %s503_s11 }
 0x1c3   : > { %s685_s12 = scalar_lea.vmem %s504_s11, 32  ;;  %p692_p1 = scmp.lt.s32.totalorder %s504_s11, %s504_s11 }
 0x1c4   : > { %p686_p12 = scmp.ne.s32.totalorder %s504_s11, %s685_s12  ;;  %p693_p2 = scmp.lt.s32.totalorder %s685_s12, %s685_s12 }
 0x1c6   : > { %p687_p13 = pnand %p686_p12, %p861_p11  ;;  %p694_p3 = por %p693_p2, %p692_p1 }
 0x1c8   : > { %p688_p0 = pneg %p687_p13 }
 0x1ca   : > { %p695_p4 = pnand %p694_p3, %p688_p0 }
 0x1cc   : > { %698 = shalt.err (!%p695_p4)
}
 0x1cd   : > { %628 = dma.vmem_to_hbm [thread:$0]  (%p861_p11), %s504_s11, 32, %s896_s5, [#allocation5]  }
 0x1ce   : > { %730 = dma.done.wait (%p861_p11), [#allocation5], 32  }
 0x1cf   : > { %732 = vsyncadd (%p861_p11), [#allocation5], 4294967264 }
 0x1d0 PF: > { %s18_s25 = sadd.s32 1, %s751_s25   ;;  %s899_s21 = smov %s739_s22 }
 0x1d1   : > { %p15_p5 = scmp.ge.s32.totalorder %s18_s25, 4   ;;  %s900_s22 = smov %s828_s30 }
 0x1d2   : > { %s901_s23 = smov %s747_s24  ;;  %s902_s24 = smov %s904_s27 }
 0x1d3   :  { %17 = sbr.rel (!%p15_p5) target bundleno = 3 (0x3), region = 137 }
 0x1d8   :  { %526 = vsyncpa [#allocation5], 1 }
 0x1d9   :  { %528 = vsyncpa [#allocation5 + $0x1], 1 }

</bundles_post_ra>
